<compile_context>
chip_gen: v7x
topology: tpu7x:2x2x1
jax: 0.10.0
libtpu: 0.0.40
codegen_flags: <defaults>
</compile_context>

<pallas_src>
import jax
import jax.numpy as jnp
from jax.experimental import pallas as pl
from jax.experimental.pallas import tpu as pltpu


def _cdiv(a, b):
    return -(-a // b)


def _vmem_budget_bytes():
    """~75% of physical VMEM (~48 MiB on v7x, ~96 MiB on v5e/v6e)."""
    try:
        cap = int(pltpu.get_tpu_info().vmem_capacity_bytes)
    except Exception:
        cap = 64 << 20          # conservative fallback (valid on every generation)
    return (cap * 3) // 4


def _plan_tiles(B, C_in, C_out, HW, x_isz, w_isz, osz, budget, spatial_target):
    """Pick (tile_co, tile_ci, tn) so the pipelined footprint fits `budget`."""
    tile_co = C_out if C_out <= 1024 else 512          # cap weight/output rows
    n_co = _cdiv(C_out, tile_co)

    def footprint(tile_ci, tn):
        n_ci = 1 if tile_ci == C_in else C_in // tile_ci
        w_buf = 1 if (n_co == 1 and n_ci == 1) else 2   # resident -> single buffer
        b_buf = 1 if n_co == 1 else 2
        f = (2 * tile_ci * tn * x_isz                   # x tiles (double-buffered)
             + 2 * tile_co * tn * osz                   # output tiles
             + w_buf * tile_co * tile_ci * w_isz        # weight
             + b_buf * tile_co * 128 * 4)               # bias (lane padded)
        if n_ci > 1:
            f += tile_co * tn * 4                       # f32 accumulator scratch
        return f + (3 << 20)                            # Mosaic internal-scratch headroom

    # Spatial-tile candidates (multiples of 128), largest first; a full-extent
    # block is always layout-legal so HW itself leads when it is small enough.
    base = [t for t in (2048, 1536, 1024, 768, 512, 384, 256, 128)
            if t <= spatial_target] or [128]
    if HW <= spatial_target:
        tn_cands = [HW] + [t for t in base if t < HW]
    else:
        tn_cands = [t for t in base if t <= HW] or [HW]

    # Reduction-tile candidates: full C_in first, then the largest
    # multiple-of-128 exact divisor <= 1024 (exact -> no ragged reduction tail).
    ci_cands = [C_in]
    if C_in > 1024 and C_in % 128 == 0:
        for cand in range(1024, 0, -128):
            if C_in % cand == 0:
                ci_cands.append(cand)
                break

    # Pass 1: keep C_in untiled; never shrink the lane tile below 512 here.
    for tn in tn_cands:
        if tn < 512 and tn != HW:
            break
        if footprint(C_in, tn) <= budget:
            return tile_co, C_in, tn
    # Pass 2: tile the reduction dim instead (keeps wide, lane-dense tiles).
    for tile_ci in ci_cands[1:]:
        for tn in tn_cands:
            if footprint(tile_ci, tn) <= budget:
                return tile_co, tile_ci, tn
    # Pass 3: last resort — shrink tn with C_in untiled.
    for tn in tn_cands:
        if footprint(C_in, tn) <= budget:
            return tile_co, C_in, tn
    return tile_co, ci_cands[-1], tn_cands[-1]


def linear_1x1_conv(x_nchw, weight, bias, *, spatial_tile=None,
                    compute_dtype=None, out_dtype=None,
                    allow_xla_fallback=True):
    """Equivalent of nn.Conv2d(c_in, c_out, kernel_size=(1,1), bias=True).

    x_nchw : (B, C_in, H, W)
    weight : (C_out, C_in, 1, 1)   (PyTorch layout)
    bias   : (C_out,)
    compute_dtype : MXU operand dtype, applied INSIDE the kernel (no extra HBM
        pass).  bf16 is the fast path on v5e's bf16-native MXU; accumulation
        and the bias add stay f32.
    out_dtype : output dtype (default: x.dtype).  bf16 halves the write stream
        of this HBM-bound kernel when downstream tolerates it.
    """
    B, C_in, H, W = x_nchw.shape
    C_out = weight.shape[0]
    HW = H * W

    out_dtype = jnp.dtype(out_dtype if out_dtype is not None else x_nchw.dtype)
    mxu_dtype = jnp.dtype(compute_dtype if compute_dtype is not None else x_nchw.dtype)

    w_mat = weight.reshape(C_out, C_in).astype(mxu_dtype)   # tiny wrapper cast only
    b_col = bias.reshape(C_out, 1).astype(jnp.float32)      # f32 bias add

    # Tiny problems: fused XLA op beats per-grid-step (~0.35 us) overhead.
    if allow_xla_fallback and (min(C_in, C_out) < 32 or B * HW < 512):
        y = jnp.einsum("oc,bchw->bohw",
                       w_mat.astype(jnp.float32), x_nchw.astype(jnp.float32))
        y = y + bias.astype(jnp.float32)[None, :, None, None]
        return y.astype(out_dtype)

    x3 = x_nchw.reshape(B, C_in, HW)     # free reshape: NCHW is (C_in, H*W) row-major per batch
    x_isz = jnp.dtype(x_nchw.dtype).itemsize
    w_isz = jnp.dtype(mxu_dtype).itemsize
    osz = out_dtype.itemsize

    budget = _vmem_budget_bytes()
    if spatial_tile is None:
        # v5e/v6e (128 MiB physical) can afford 2048-lane tiles; v7x cannot.
        spatial_tile = 2048 if budget >= (80 << 20) else 1024

    tile_co, tile_ci, tn = _plan_tiles(B, C_in, C_out, HW,
                                       x_isz, w_isz, osz, budget, spatial_tile)
    n_co = _cdiv(C_out, tile_co)
    n_ci = 1 if tile_ci == C_in else C_in // tile_ci
    n_hw = _cdiv(HW, tn)

    # v7x megacore guard: make sure the parallel grid has >= 2 points so both
    # TensorCores get work (one extra cheap step on v5e/v6e).
    if n_co * B * n_hw < 2 and HW >= 256:
        tn = (((HW + 1) // 2) + 127) // 128 * 128
        n_hw = _cdiv(HW, tn)

    w_buffers = 1 if (n_co == 1 and n_ci == 1) else 2
    b_buffers = 1 if n_co == 1 else 2

    def _spec(shape, index_map, buffers):
        if buffers == 1:
            # Constant index_map -> resident block; a second buffer is dead VMEM.
            return pl.BlockSpec(shape, index_map, pipeline_mode=pl.Buffered(1))
        return pl.BlockSpec(shape, index_map)

    if n_ci == 1:
        def kernel(w_ref, b_ref, x_ref, o_ref):
            acc = jnp.dot(w_ref[...], x_ref[...].astype(mxu_dtype),
                          preferred_element_type=jnp.float32)
            o_ref[...] = (acc + b_ref[...]).astype(o_ref.dtype)

        grid = (n_co, B, n_hw)
        in_specs = [
            _spec((tile_co, C_in), lambda co, b, j: (co, 0), w_buffers),
            _spec((tile_co, 1), lambda co, b, j: (co, 0), b_buffers),
            pl.BlockSpec((None, C_in, tn), lambda co, b, j: (b, 0, j)),
        ]
        out_specs = pl.BlockSpec((None, tile_co, tn), lambda co, b, j: (b, co, j))
        scratch_shapes = []
        dims = ("parallel", "parallel", "parallel")
    else:
        def kernel(w_ref, b_ref, x_ref, o_ref, acc_ref):
            k = pl.program_id(3)

            @pl.when(k == 0)
            def _():
                acc_ref[...] = jnp.zeros_like(acc_ref)

            acc_ref[...] += jnp.dot(w_ref[...], x_ref[...].astype(mxu_dtype),
                                    preferred_element_type=jnp.float32)

            @pl.when(k == pl.num_programs(3) - 1)
            def _():
                o_ref[...] = (acc_ref[...] + b_ref[...]).astype(o_ref.dtype)

        grid = (n_co, B, n_hw, n_ci)
        in_specs = [
            _spec((tile_co, tile_ci), lambda co, b, j, k: (co, k), w_buffers),
            _spec((tile_co, 1), lambda co, b, j, k: (co, 0), b_buffers),
            pl.BlockSpec((None, tile_ci, tn), lambda co, b, j, k: (b, k, j)),
        ]
        out_specs = pl.BlockSpec((None, tile_co, tn),
                                 lambda co, b, j, k: (b, co, j))
        scratch_shapes = [pltpu.VMEM((tile_co, tn), jnp.float32)]
        dims = ("parallel", "parallel", "parallel", "arbitrary")

    # Explicit scoped-VMEM limit: actual footprint + headroom, capped at the
    # per-generation budget (never the full physical capacity).
    fp = (2 * tile_ci * tn * x_isz + 2 * tile_co * tn * osz
          + w_buffers * tile_co * tile_ci * w_isz
          + b_buffers * tile_co * 128 * 4
          + (tile_co * tn * 4 if n_ci > 1 else 0)
          + (3 << 20))
    vmem_limit = int(min(max(fp, 16 << 20), budget))

    cost = pl.CostEstimate(
        flops=2 * B * HW * C_in * C_out,
        transcendentals=0,
        bytes_accessed=(x3.size * x_isz + w_mat.size * w_isz
                        + b_col.size * 4 + B * HW * C_out * osz),
    )

    out3 = pl.pallas_call(
        kernel,
        out_shape=jax.ShapeDtypeStruct((B, C_out, HW), out_dtype),
        grid_spec=pltpu.PrefetchScalarGridSpec(
            num_scalar_prefetch=0,
            grid=grid,
            in_specs=in_specs,
            out_specs=out_specs,
            scratch_shapes=scratch_shapes,
        ),
        compiler_params=pltpu.CompilerParams(
            dimension_semantics=dims,
            vmem_limit_bytes=vmem_limit,
        ),
        cost_estimate=cost,
    )(w_mat, b_col, x3)

    return out3.reshape(B, C_out, H, W)


if __name__ == "__main__":
    key = jax.random.PRNGKey(0)
    k_x, k_w, k_b = jax.random.split(key, 3)

    B, C_in, H, W = 2, 4, 16, 16
    C_out = 8

    x = jax.random.normal(k_x, (B, C_in, H, W), dtype=jnp.float32)
    # Deterministic "Conv2d" params (PyTorch weight layout (C_out, C_in, 1, 1)).
    bound = 1.0 / (C_in ** 0.5)
    weight = jax.random.uniform(k_w, (C_out, C_in, 1, 1), minval=-bound,
                                maxval=bound, dtype=jnp.float32)
    bias = jax.random.uniform(k_b, (C_out,), minval=-bound, maxval=bound,
                              dtype=jnp.float32)

    # Plain-JAX reference of the 1x1 conv.
    y_ref = jnp.einsum("bchw,oc->bohw", x, weight.reshape(C_out, C_in)) \
        + bias[None, :, None, None]

    # f32 Pallas path (exact semantics of the PyTorch module); fallback bypassed
    # so the kernel itself is exercised at this small shape.
    y = linear_1x1_conv(x, weight, bias, allow_xla_fallback=False)
    jax.block_until_ready(y)
    assert y.shape == (B, C_out, H, W)
    assert jnp.allclose(y, y_ref, atol=1e-5, rtol=1e-5)

    # bf16-compute path: operands rounded to bf16 INSIDE the kernel (no extra
    # wrapper-side HBM pass), f32 accumulate + f32 bias add, f32 output.
    y_bf16c = linear_1x1_conv(x, weight, bias, compute_dtype=jnp.bfloat16,
                              allow_xla_fallback=False)
    jax.block_until_ready(y_bf16c)
    assert y_bf16c.dtype == y.dtype
    assert jnp.allclose(y_bf16c, y_ref, atol=5e-2, rtol=5e-2)

    # bf16-output path: halves the write stream of this HBM-bound kernel.
    y_bf16o = linear_1x1_conv(x, weight, bias, out_dtype=jnp.bfloat16,
                              allow_xla_fallback=False)
    jax.block_until_ready(y_bf16o)
    assert y_bf16o.dtype == jnp.bfloat16
    assert jnp.allclose(y_bf16o.astype(jnp.float32), y_ref, atol=5e-2, rtol=5e-2)

    # Dispatch sanity: the tiny-problem XLA fallback matches too.
    y_fb = linear_1x1_conv(x, weight, bias)
    jax.block_until_ready(y_fb)
    assert jnp.allclose(y_fb, y_ref, atol=1e-5, rtol=1e-5)

    print("KERNEL_OK")
</pallas_src>

<mosaic_0001>
module attributes {stable_mosaic.version = 11 : i64} {
  func.func @kernel(%arg0: i32, %arg1: i32, %arg2: i32, %arg3: memref<8x4xf32, #tpu.memory_space<vmem>>, %arg4: memref<8x1xf32, #tpu.memory_space<vmem>>, %arg5: memref<1x4x256xf32, #tpu.memory_space<vmem>>, %arg6: memref<1x8x256xf32, #tpu.memory_space<vmem>>) attributes {dimension_semantics = [#tpu.dimension_semantics<parallel>, #tpu.dimension_semantics<parallel>, #tpu.dimension_semantics<parallel>], iteration_bounds = array<i64: 1, 2, 1>, scalar_prefetch = 0 : i64, scratch_operands = 0 : i64, tpu.core_type = #tpu.core_type<tc>, window_params = [{pipeline_mode = #tpu.pipeline_mode<synchronous>, transform_indices = @transform_0, window_bounds = array<i64: 8, 4>}, {pipeline_mode = #tpu.pipeline_mode<synchronous>, transform_indices = @transform_1, window_bounds = array<i64: 8, 1>}, {transform_indices = @transform_2, window_bounds = array<i64: 1, 4, 256>}, {transform_indices = @transform_3, window_bounds = array<i64: 1, 8, 256>}]} {
    %c0 = arith.constant 0 : index
    %c0_0 = arith.constant 0 : index
    %0 = vector.load %arg3[%c0, %c0_0] : memref<8x4xf32, #tpu.memory_space<vmem>>, vector<8x4xf32>
    %c0_1 = arith.constant 0 : index
    %c0_2 = arith.constant 0 : index
    %c0_3 = arith.constant 0 : index
    %1 = vector.load %arg5[%c0_1, %c0_2, %c0_3] : memref<1x4x256xf32, #tpu.memory_space<vmem>>, vector<1x4x256xf32>
    %2 = vector.shape_cast %1 : vector<1x4x256xf32> to vector<4x256xf32>
    %cst = arith.constant dense<0.000000e+00> : vector<8x256xf32>
    %3 = tpu.matmul %0, %2, %cst {dimension_numbers = #tpu.dot_dimension_numbers<[1], [0], [0], [1], [0, 0, 1, 1], [], []>} : vector<8x4xf32>, vector<4x256xf32>, vector<8x256xf32> -> vector<8x256xf32>
    %c0_4 = arith.constant 0 : index
    %c0_5 = arith.constant 0 : index
    %4 = vector.load %arg4[%c0_4, %c0_5] : memref<8x1xf32, #tpu.memory_space<vmem>>, vector<8x1xf32>
    %5 = vector.broadcast %4 : vector<8x1xf32> to vector<8x256xf32>
    %6 = arith.addf %3, %5 : vector<8x256xf32>
    %c0_6 = arith.constant 0 : index
    %c0_7 = arith.constant 0 : index
    %c0_8 = arith.constant 0 : index
    %7 = vector.load %arg6[%c0_6, %c0_7, %c0_8] : memref<1x8x256xf32, #tpu.memory_space<vmem>>, vector<1x8x256xf32>
    %8 = vector.shape_cast %7 : vector<1x8x256xf32> to vector<8x256xf32>
    %9 = vector.shape_cast %6 : vector<8x256xf32> to vector<1x8x256xf32>
    tpu.vector_store %arg6[%c0_6, %c0_7, %c0_8], %9 {strides = array<i32>} : memref<1x8x256xf32, #tpu.memory_space<vmem>>, vector<1x8x256xf32>,
    return
  }
  func.func @transform_0(%arg0: i32, %arg1: i32, %arg2: i32) -> (i32, i32) {
    %c0_i32 = arith.constant 0 : i32
    %c0_i32_0 = arith.constant 0 : i32
    return %arg0, %c0_i32 : i32, i32
  }
  func.func @transform_1(%arg0: i32, %arg1: i32, %arg2: i32) -> (i32, i32) {
    %c0_i32 = arith.constant 0 : i32
    %c0_i32_0 = arith.constant 0 : i32
    return %arg0, %c0_i32 : i32, i32
  }
  func.func @transform_2(%arg0: i32, %arg1: i32, %arg2: i32) -> (i32, i32, i32) {
    %c0_i32 = arith.constant 0 : i32
    %c0_i32_0 = arith.constant 0 : i32
    return %arg1, %c0_i32, %arg2 : i32, i32, i32
  }
  func.func @transform_3(%arg0: i32, %arg1: i32, %arg2: i32) -> (i32, i32, i32) {
    %c0_i32 = arith.constant 0 : i32
    return %arg1, %arg0, %arg2 : i32, i32, i32
  }
}

</mosaic_0001>

<bundles_post_ra>
// kernel: tpu_custom_call.1
= control target key start
LH: loop header
LB: loop body
LE: loop exit
PB: predicated region body
PF: predicated region fallthrough
CT: control target
= control target key end

     0   :  { %8 = vsyncpa [#allocation3], 0  ;;  %s765_s0 = inlined_call_operand.vmem [shape: f32[8,4], index: 0, kind: input, shape index: {}]   ;;  %s766_s1 = inlined_call_operand.vmem [shape: f32[8,1], index: 1, kind: input, shape index: {}]   ;;  %s767_s2 = inlined_call_operand.vmem [shape: f32[2,4,256], index: 2, kind: input, shape index: {}]   ;;  %s768_s3 = inlined_call_operand.hbm [shape: f32[2,8,256], index: 3, kind: output, shape index: {}]  }
   0x1   :  { %10 = vsyncpa [#allocation3 + $0x1], 0  ;;  %s647_s12 = smov 0   ;;  %s649_s13 = smov 0  }
   0x2   :  { %s651_s14 = smov 0   ;;  %s653_s15 = smov 0  }
   0x3   :  { %s655_s16 = smov 0   ;;  %s657_s17 = smov 0  }
   0x4 LB: > { %s465_s18 = sadd.s32 4294967295, %s622_s17   ;;  %s466_s19 = sadd.s32 4294967294, %s622_s17   ;;  %s622_s17 = sphi %s657_s17, %s16_s17   ;;  %s618_s16 = sphi %s655_s16, %s775_s16   ;;  %s614_s15 = sphi %s653_s15, %s774_s15   ;;  %s610_s14 = sphi %s651_s14, %s773_s14   ;;  %s606_s13 = sphi %s649_s13, %s772_s13   ;;  %s602_s12 = sphi %s647_s12, %s771_s12  }
   0x5   : > { %s31_s20 = sadd.s32 1, %s618_s16  ;;  %s126_s21 = sadd.s32 1, %s610_s14 }
   0x6   : > { %p33_p0 = scmp.ge.s32.totalorder %s31_s20, 2  ;;  %p136_p1 = scmp.ne.s32.totalorder %s610_s14, %s606_s13 }
   0x7   : > { %p137_p2 = scmp.eq.s32.totalorder %s465_s18, 1  ;;  %p142_p3 = scmp.ne.s32.totalorder %s606_s13, %s602_s12 }
   0x8   : > { %s777_s20 = smov (%p33_p0, %s31_s20), 0  ;;  %p143_p5 = scmp.eq.s32.totalorder %s466_s19, 1 }
   0x9   : > { %p687_p4 = por %p137_p2, %p136_p1  ;;  %s119_s23 = ssub.s32 %s618_s16, %s777_s20 }
   0xa   : > { %p471_p6 = scmp.ge.s32.totalorder %s622_s17, 1  ;;  %p124_p7 = scmp.eq.s32.totalorder %s119_s23, 0 }
   0xb   : > { %p694_p8 = por %p143_p5, %p142_p3  ;;  %p188_p9 = scmp.lt.s32.totalorder %s622_s17, 3 }
   0xc   : > { %s700_s25 = scalar_select %p124_p7, %s610_s14, %s126_s21  }
   0xd   : > { %p189_p10 = pnand %p471_p6, %p188_p9 }
   0xe   : > { %p233_p11 = scmp.lt.s32.totalorder (!%p189_p10), %s614_s15, 1  ;;  %v624_v0 = vmov (!%p189_p10), 0.0   ;;  %v625_v1 = vmov (!%p189_p10), 0   ;;  %v245_v2 = vld [vmem:[%s766_s1] sm:$0xff] (!%p189_p10)  ;;  %vm257_vm0 = vcmask (!%p189_p10), 1043456   ;;  %vm253_vm1 = vcmask (!%p189_p10), 31744  }
   0xf   : > { %192 = sbr.rel (%p189_p10) target bundleno = 260 (0x104), region = 32  ;;  %326 = vmatprep.mubr.f32.mxu0 (!%p189_p10), %v624_v0  ;;  %542 = vset.pattern.permute.xlu0 (!%p189_p10), %v625_v1  ;;  %v243_v5 = vld [vmem:[%s765_s0] sm:$0xff] (!%p189_p10)  ;;  %s221_s8 = sand.u32 (!%p189_p10), 1, %s606_s13  }
  0x10   : > { %248 = vperm.xlu0 (!%p189_p10), %542, %v245_v2   ;;  %s472_s9 = sshll.u32 (!%p189_p10), %s221_s8, 4  ;;  %s484_s10 = sshll.u32 (!%p189_p10), %s614_s15, 8 }
  0x11   : > { %s223_s11 = scalar_lea.vmem (!%p189_p10), [#allocation2], %s472_s9  ;;  %s718_s23 = scalar_lea.hbm (!%p189_p10), %s768_s3, %s484_s10 }
  0x12   : > { %s354_s18 = sshll.u32 (!%p189_p10), %s223_s11, 4  ;;  %s336_s26 = scalar_lea.sflag (!%p189_p10), [#allocation3], %s221_s8  ;;  %s720_s18 = int_to_ptr.vmem [resolvable:$true] %s354_s18 }
  0x13   : > { %s626_s27 = smov (!%p189_p10), [#allocation2]  }
  0x16   : > { %s234_s28 = scalar_select %p233_p11, %s614_s15, 1 }
  0x17   : > { %s544_s15 = scalar_lea.vmem %s720_s18, 256 }
  0x18   : > { %s483_s29 = sshll.u32 %s234_s28, 3  ;;  %p545_p12 = scmp.ne.s32.totalorder %s720_s18, %s544_s15 }
  0x19   : > { %s240_s5 = scalar_lea.vmem %s767_s2, %s483_s29  ;;  %s548_s28 = sshll.u32 %s626_s27, 4  ;;  %s549_s28 = int_to_ptr.vmem [resolvable:$false] %s548_s28 }
  0x1a   : > { %v244_v3 = vld [vmem:[%s240_s5] sm:$0xff]  ;;  %p546_p13 = pnand %p545_p12, %p687_p4  ;;  %s550_s29 = scalar_lea.vmem %s549_s28, 512 }
  0x1b   : > { %v252_v4 = vcombine.high %v244_v3, %v244_v3  ;;  %p551_p1 = scmp.lt.s32.totalorder %s720_s18, %s549_s28  ;;  %p552_p2 = scmp.lt.s32.totalorder %s550_s29, %s544_s15 }
  0x1c   : > { %p547_p0 = pneg %p546_p13 }
  0x1d   : > { %475 = vmatprep.subr.msk.mxu0 %vm257_vm0, %v252_v4  ;;  %p553_p3 = por %p552_p2, %p551_p1 }
  0x1e   : > { %476 = vmatpush1.msk.msra.mxu0 %vm257_vm0, %v244_v3 }
  0x1f   : > { %477 = vmatmul.mubr.msk.f32.vlgmr.msra.gmra.mrb[0].mxu0 %vm253_vm1, %v243_v5  ;;  %p554_p5 = pnand %p553_p3, %p547_p0 }
  0x8f   : > { %v249_v6 = vpop.permute.xlu0 %248 }
  0xf2   : > { %v328_v7 = vpop.f32.mrb[0].mxu0 }
  0xf3   : > { %v329_v8 = vadd.f32 %v328_v7, %v249_v6  ;;  %v330_v9 = vpop.f32.mrb[1].mxu0 }
  0xf4   : > { %v331_v10 = vadd.f32 %v330_v9, %v249_v6 }
  0xf5   : > { %333 = vst [vmem:[%s223_s11] sm:$0xff] %v329_v8 }
  0xf6   : > { %334 = vst [vmem:[%s223_s11 + $0x8] sm:$0xff] %v331_v10 }
  0xf7   : > { %557 = shalt.err (!%p554_p5)
}
  0xf8   : > { %s558_s30 = scalar_lea.hbm %s718_s23, 256  ;;  %s562_s6 = scalar_lea.hbm %s768_s3, 512 }
  0xf9   : > { %p559_p6 = scmp.ne.s32.totalorder %s718_s23, %s558_s30  ;;  %p563_p10 = scmp.lt.u32.totalorder %s718_s23, %s768_s3 }
  0xfa   : > { %p564_p11 = scmp.lt.u32.totalorder %s562_s6, %s558_s30  ;;  %p566_p13 = scmp.lt.u32.totalorder %s558_s30, %s718_s23 }
  0xfb   : > { %p560_p7 = pnand %p559_p6, %p687_p4 }
  0xfc   : > { %p565_p12 = por %p564_p11, %p563_p10 }
  0xfd   : > { %p561_p9 = pneg %p560_p7 }
  0xfe   : > { %p567_p0 = por %p566_p13, %p565_p12 }
 0x100   : > { %p568_p1 = pnand %p567_p0, %p561_p9 }
 0x102   : > { %571 = shalt.err (!%p568_p1)
}
 0x103   : > { %485 = dma.vmem_to_hbm [thread:$0]  (%p687_p4), %s720_s18, 256, %s718_s23, %s336_s26  }
 0x104 PF: > { %p491_p2 = scmp.ge.s32.totalorder %s622_s17, 2  ;;  %s366_s9 = sand.u32 1, %s602_s12  }
 0x105   : > { %s367_s10 = scalar_lea.sflag [#allocation3], %s366_s9 }
 0x106   : > { %p488_p3 = pnand %p491_p2, %p694_p8 }
 0x108   : > { %597 = dma.done.wait (!%p488_p3), %s367_s10, 256  }
 0x109   : > { %599 = vsyncadd (!%p488_p3), %s367_s10, 4294967040  ;;  %s16_s17 = sadd.s32 1, %s622_s17   ;;  %s771_s12 = smov %s606_s13 }
 0x10a   : > { %p13_p5 = scmp.ge.s32.totalorder %s16_s17, 4   ;;  %s772_s13 = smov %s610_s14 }
 0x10b   : > { %s773_s14 = smov %s700_s25  ;;  %s774_s15 = smov %s618_s16 }
 0x10c   : > { %s775_s16 = smov %s777_s20  ;;  %15 = sbr.rel (!%p13_p5) target bundleno = 4 (0x4), region = 73 }
 0x113   :  { %372 = vsyncpa [#allocation3], 1 }
 0x114   :  { %374 = vsyncpa [#allocation3 + $0x1], 1 }

</bundles_post_ra>
